<compile_context>
chip_gen: v7x
topology: tpu7x:2x2x1
jax: 0.10.0
libtpu: 0.0.40
codegen_flags: <defaults>
</compile_context>

<pallas_src>
import functools

import jax
import jax.numpy as jnp
from jax.experimental import pallas as pl
from jax.experimental.pallas import tpu as pltpu


# --------------------------------------------------------------------------- #
# Kernel: one streaming affine + sigmoid over a lane-dense batch tile.
# --------------------------------------------------------------------------- #
def _fused_kernel(x_ref, w_ref, b_ref, out_ref):
    # x_ref   : (D, B_TILE)  flattened [metrics | struct | extra] inputs, batch on lanes
    # w_ref   : (1, D)       fully folded weight (conv1/conv2 + linear1 + linear2)
    # b_ref   : (1, 1)       fully folded bias, SMEM scalar
    # out_ref : (1, B_TILE)  sigmoid outputs, lane-dense unmasked store
    y = jnp.dot(w_ref[...], x_ref[...], preferred_element_type=jnp.float32)
    out_ref[...] = jax.nn.sigmoid(y + b_ref[0, 0]).astype(out_ref.dtype)


# --------------------------------------------------------------------------- #
# Host-side fold (run ONCE per parameter set, outside the per-batch call).
# --------------------------------------------------------------------------- #
def fold_params(params, *, metrics_len, struct_len=None, n_units=32, struct=True):
    """Fold conv1/conv2 -> flatten -> linear1 -> linear2 into one (1, D) affine."""
    nu = n_units
    L = metrics_len
    l1 = L - 2
    c_in = params["conv1_w"].shape[1]

    lw1 = params["linear1_w"].astype(jnp.float32)               # (nu, flatten_dim)
    w1a = lw1[:, :nu * l1].reshape(nu, nu, l1)                   # [u, o, t] metrics cols

    # conv1 composed with linear1: A_met[u, c, t+k] += W1a[u,o,t] * conv1_w[o,c,k]
    a_met = jnp.zeros((nu, c_in, L), jnp.float32)
    for k in range(3):
        a_met = a_met.at[:, :, k:k + l1].add(
            jnp.einsum('uot,oc->uct', w1a,
                       params["conv1_w"][:, :, k].astype(jnp.float32)))
    b_h = params["linear1_b"].astype(jnp.float32) + \
        jnp.einsum('uot,o->u', w1a, params["conv1_b"].astype(jnp.float32))

    pieces = [a_met.reshape(nu, c_in * L)]
    col = nu * l1
    if struct:
        Ls = struct_len
        cs = params["conv2_w"].shape[1]
        l2 = Ls - 2
        w1b = lw1[:, col:col + nu * l2].reshape(nu, nu, l2)      # struct-branch cols
        col += nu * l2
        a_str = jnp.zeros((nu, cs, Ls), jnp.float32)
        for k in range(3):
            a_str = a_str.at[:, :, k:k + l2].add(
                jnp.einsum('uot,oc->uct', w1b,
                           params["conv2_w"][:, :, k].astype(jnp.float32)))
        b_h = b_h + jnp.einsum('uot,o->u', w1b,
                               params["conv2_b"].astype(jnp.float32))
        pieces.append(a_str.reshape(nu, cs * Ls))
    pieces.append(lw1[:, col:])                                  # extra-params columns

    A = jnp.concatenate(pieces, axis=1)                          # (nu, D)
    l2w = params["linear2_w"].reshape(1, nu).astype(jnp.float32)
    l2b = params["linear2_b"].astype(jnp.float32).reshape(())

    w_fold = l2w @ A                                             # (1, D)
    b_fold = (l2w @ b_h.reshape(nu, 1)).reshape(()) + l2b        # scalar
    return {"w_fold": w_fold, "b_fold": b_fold.reshape(1, 1)}


def _pick_b_tile(batch, b_tile_max):
    # Keep >= 2 grid steps (so v7x's two TensorCores both get work under the
    # "parallel" axis), stay a multiple of 128 lanes, and cap at b_tile_max
    # (double-buffered f32 X of (D, b_tile) stays well under v5e's 16 MiB
    # default scoped VMEM for any sane D at b_tile <= 8192).
    half = pl.cdiv(batch, 2)
    cap = max(128, ((half + 127) // 128) * 128)
    tile = min(b_tile_max, cap)
    return max(128, (tile // 128) * 128)


# --------------------------------------------------------------------------- #
# Per-batch forward (jitted so concat/transpose/pad fuse into one copy of X).
# --------------------------------------------------------------------------- #
@functools.partial(jax.jit, static_argnames=("struct", "b_tile_max", "use_bf16"))
def branched_predictor(metrics, struct_in, extra, folded, *, struct=True,
                       b_tile_max=2048, use_bf16=False):
    B = metrics.shape[0]
    w_fold = folded["w_fold"].astype(jnp.float32)
    b_fold = folded["b_fold"].astype(jnp.float32).reshape(1, 1)
    D = w_fold.shape[1]

    pieces_x = [metrics.reshape(B, -1)]
    if struct:
        pieces_x.append(struct_in.reshape(B, -1))
    pieces_x.append(extra)
    X = jnp.concatenate(pieces_x, axis=1).T                      # (D, B): batch on lanes

    in_dtype = jnp.bfloat16 if use_bf16 else jnp.float32
    X = X.astype(in_dtype)
    w = w_fold.astype(in_dtype)

    b_tile = _pick_b_tile(B, b_tile_max)
    n_tiles = pl.cdiv(B, b_tile)
    b_pad = n_tiles * b_tile
    if b_pad != B:
        # Padded columns are sliced off below; pad fuses with the concat/T under jit.
        X = jnp.pad(X, ((0, 0), (0, b_pad - B)))

    cost = pl.CostEstimate(
        flops=2 * D * b_pad + b_pad,
        transcendentals=b_pad,
        bytes_accessed=(D * b_pad + D) * X.dtype.itemsize + b_pad * 4,
    )

    out = pl.pallas_call(
        _fused_kernel,
        out_shape=jax.ShapeDtypeStruct((1, b_pad), jnp.float32),
        grid=(n_tiles,),
        in_specs=[
            pl.BlockSpec((D, b_tile), lambda i: (0, i)),             # streamed batch tiles
            pl.BlockSpec((1, D), lambda i: (0, 0)),                  # grid-invariant weight
            pl.BlockSpec(memory_space=pltpu.MemorySpace.SMEM),       # scalar bias in SMEM
        ],
        out_specs=pl.BlockSpec((1, b_tile), lambda i: (0, i)),
        compiler_params=pltpu.CompilerParams(
            dimension_semantics=("parallel",)),                      # shard tiles over TCs
        cost_estimate=cost,
    )(X, w, b_fold)

    return out[0, :B].reshape(B, 1).astype(jnp.float32)


# --------------------------------------------------------------------------- #
# Pure-JAX reference matching the PyTorch forward.
# --------------------------------------------------------------------------- #
def reference(metrics, struct_in, extra, params, *, struct=True):
    def conv1d(x, w, b):
        Bx, C, L = x.shape
        O, _, K = w.shape
        out = jnp.zeros((Bx, O, L - K + 1), jnp.float32)
        for k in range(K):
            out = out + jnp.einsum('bcl,oc->bol', x[:, :, k:k + L - K + 1], w[:, :, k])
        return out + b[None, :, None]

    B = metrics.shape[0]
    parts = [conv1d(metrics, params["conv1_w"], params["conv1_b"]).reshape(B, -1)]
    if struct:
        parts.append(conv1d(struct_in, params["conv2_w"],
                            params["conv2_b"]).reshape(B, -1))
    parts.append(extra)
    x = jnp.concatenate(parts, axis=1)
    h = x @ params["linear1_w"].T + params["linear1_b"]
    y = h @ params["linear2_w"].T + params["linear2_b"]
    return jax.nn.sigmoid(y)


if __name__ == "__main__":
    key = jax.random.PRNGKey(0)
    # Shapes consistent with the module; B=200 exercises two batch tiles + padding.
    B, c_in, L, n_params, nu = 200, 4, 16, 8, 32
    cs, Ls = 10, 7                                  # conv2: 10 channels, length 7 -> 5
    flat_true = nu * (L - 2) + nu * 5 + n_params    # struct=True linear1 in-dim
    flat_false = nu * (L - 2) + n_params            # struct=False linear1 in-dim

    ks = jax.random.split(key, 12)
    params = {
        "conv1_w": jax.random.normal(ks[0], (nu, c_in, 3), jnp.float32) * 0.1,
        "conv1_b": jax.random.normal(ks[1], (nu,), jnp.float32) * 0.1,
        "conv2_w": jax.random.normal(ks[2], (nu, cs, 3), jnp.float32) * 0.1,
        "conv2_b": jax.random.normal(ks[3], (nu,), jnp.float32) * 0.1,
        "linear1_w": jax.random.normal(ks[4], (nu, flat_true), jnp.float32) * 0.05,
        "linear1_b": jax.random.normal(ks[5], (nu,), jnp.float32) * 0.05,
        "linear2_w": jax.random.normal(ks[6], (1, nu), jnp.float32) * 0.1,
        "linear2_b": jax.random.normal(ks[7], (1,), jnp.float32) * 0.1,
    }
    metrics = jax.random.normal(ks[8], (B, c_in, L), jnp.float32)
    struct_in = jax.random.normal(ks[9], (B, cs, Ls), jnp.float32)
    extra = jax.random.normal(ks[10], (B, n_params), jnp.float32)

    # ---- struct=True path ----
    folded_t = fold_params(params, metrics_len=L, struct_len=Ls,
                           n_units=nu, struct=True)
    out_t = jax.block_until_ready(
        branched_predictor(metrics, struct_in, extra, folded_t, struct=True))
    ref_t = reference(metrics, struct_in, extra, params, struct=True)
    assert out_t.shape == (B, 1), out_t.shape
    if not jnp.allclose(out_t, ref_t, atol=1e-3, rtol=1e-3):
        raise AssertionError(f"struct=True mismatch:\n{out_t[:4]}\nvs\n{ref_t[:4]}")

    # ---- struct=False path (conv2 unused, smaller linear1) ----
    params_f = dict(params)
    params_f["linear1_w"] = jax.random.normal(ks[11], (nu, flat_false),
                                              jnp.float32) * 0.05
    folded_f = fold_params(params_f, metrics_len=L, n_units=nu, struct=False)
    out_f = jax.block_until_ready(
        branched_predictor(metrics, None, extra, folded_f, struct=False))
    ref_f = reference(metrics, None, extra, params_f, struct=False)
    assert out_f.shape == (B, 1), out_f.shape
    if not jnp.allclose(out_f, ref_f, atol=1e-3, rtol=1e-3):
        raise AssertionError(f"struct=False mismatch:\n{out_f[:4]}\nvs\n{ref_f[:4]}")

    print("KERNEL_OK")
</pallas_src>

<mosaic_0001>
module attributes {stable_mosaic.version = 11 : i64} {
  func.func @_fused_kernel(%arg0: i32, %arg1: memref<142x128xf32, #tpu.memory_space<vmem>>, %arg2: memref<1x142xf32, #tpu.memory_space<vmem>>, %arg3: memref<1x1xf32, #tpu.memory_space<smem>>, %arg4: memref<1x128xf32, #tpu.memory_space<vmem>>) attributes {dimension_semantics = [#tpu.dimension_semantics<parallel>], iteration_bounds = array<i64: 2>, scalar_prefetch = 0 : i64, scratch_operands = 0 : i64, tpu.core_type = #tpu.core_type<tc>, window_params = [{transform_indices = @transform_0, window_bounds = array<i64: 142, 128>}, {pipeline_mode = #tpu.pipeline_mode<synchronous>, transform_indices = @transform_1, window_bounds = array<i64: 1, 142>}, {transform_indices = @transform_2, window_bounds = array<i64: 1, 1>}, {transform_indices = @transform_3, window_bounds = array<i64: 1, 128>}]} {
    %c0 = arith.constant 0 : index
    %c0_0 = arith.constant 0 : index
    %0 = vector.load %arg2[%c0, %c0_0] : memref<1x142xf32, #tpu.memory_space<vmem>>, vector<1x142xf32>
    %c0_1 = arith.constant 0 : index
    %c0_2 = arith.constant 0 : index
    %1 = vector.load %arg1[%c0_1, %c0_2] : memref<142x128xf32, #tpu.memory_space<vmem>>, vector<142x128xf32>
    %cst = arith.constant dense<0.000000e+00> : vector<1x128xf32>
    %2 = tpu.matmul %0, %1, %cst {dimension_numbers = #tpu.dot_dimension_numbers<[1], [0], [0], [1], [0, 0, 1, 1], [], []>} : vector<1x142xf32>, vector<142x128xf32>, vector<1x128xf32> -> vector<1x128xf32>
    %c0_3 = arith.constant 0 : index
    %c0_4 = arith.constant 0 : index
    %3 = memref.load %arg3[%c0_3, %c0_4] : memref<1x1xf32, #tpu.memory_space<smem>>
    %4 = vector.broadcast %3 : f32 to vector<1x128xf32>
    %5 = arith.addf %2, %4 : vector<1x128xf32>
    %6 = arith.negf %5 : vector<1x128xf32>
    %7 = math.exp %6 : vector<1x128xf32>
    %cst_5 = arith.constant 1.000000e+00 : f32
    %8 = vector.broadcast %cst_5 : f32 to vector<1x128xf32>
    %9 = arith.addf %8, %7 : vector<1x128xf32>
    %10 = arith.divf %8, %9 : vector<1x128xf32>
    %c0_6 = arith.constant 0 : index
    %c0_7 = arith.constant 0 : index
    %11 = vector.load %arg4[%c0_6, %c0_7] : memref<1x128xf32, #tpu.memory_space<vmem>>, vector<1x128xf32>
    tpu.vector_store %arg4[%c0_6, %c0_7], %10 {strides = array<i32>} : memref<1x128xf32, #tpu.memory_space<vmem>>, vector<1x128xf32>,
    return
  }
  func.func @transform_0(%arg0: i32) -> (i32, i32) {
    %c0_i32 = arith.constant 0 : i32
    %c0_i32_0 = arith.constant 0 : i32
    return %c0_i32, %arg0 : i32, i32
  }
  func.func @transform_1(%arg0: i32) -> (i32, i32) {
    %c0_i32 = arith.constant 0 : i32
    %c0_i32_0 = arith.constant 0 : i32
    %c0_i32_1 = arith.constant 0 : i32
    return %c0_i32, %c0_i32_0 : i32, i32
  }
  func.func @transform_2(%arg0: i32) -> (i32, i32) {
    %c0_i32 = arith.constant 0 : i32
    %c0_i32_0 = arith.constant 0 : i32
    %c0_i32_1 = arith.constant 0 : i32
    return %c0_i32, %c0_i32_0 : i32, i32
  }
  func.func @transform_3(%arg0: i32) -> (i32, i32) {
    %c0_i32 = arith.constant 0 : i32
    %c0_i32_0 = arith.constant 0 : i32
    return %c0_i32, %arg0 : i32, i32
  }
}

</mosaic_0001>

<bundles_post_ra>
// kernel: branched_predictor.1
= control target key start
LH: loop header
LB: loop body
LE: loop exit
PB: predicated region body
PF: predicated region fallthrough
CT: control target
= control target key end

     0   :  { %s655_s0 = inlined_call_operand.vmem [shape: f32[142,256], index: 0, kind: input, shape index: {}]   ;;  %s656_s1 = inlined_call_operand.vmem [shape: f32[1,142], index: 1, kind: input, shape index: {}]   ;;  %s657_s2 = inlined_call_operand.<no memory space> [shape: f32[1,1], index: 2, kind: input, shape index: {}]   ;;  %s658_s3 = inlined_call_operand.vmem [shape: f32[1,256], index: 3, kind: output, shape index: {}]  }
   0x1   :  { %8 = sst [smem:[#allocation2]] %s657_s2 }
   0x2   :  { %s558_s14 = smov 0   ;;  %s560_s15 = smov 0  }
   0x3   :  { %s562_s16 = smov 0  }
   0x4 LB: > { %s438_s2 = sadd.s32 4294967295, %s531_s16   ;;  %s575_s17 = sadd.s32 1, %s531_s16   ;;  %s531_s16 = sphi %s562_s16, %s661_s16   ;;  %s527_s15 = sphi %s560_s15, %s660_s15   ;;  %s523_s14 = sphi %s558_s14, %s659_s14  }
   0x5   : > { %s18_s18 = ssub.s32 %s531_s16, %s575_s17  ;;  %s21_s19 = sadd.s32 1, %s527_s15 }
   0x6   : > { %p19_p0 = scmp.eq.s32.totalorder %s18_s18, 0  ;;  %p28_p1 = scmp.ne.s32.totalorder %s527_s15, %s523_s14 }
   0x7   : > { %p29_p2 = scmp.eq.s32.totalorder %s531_s16, 0  ;;  %p441_p4 = scmp.ge.s32.totalorder %s531_s16, 2 }
   0x8   : > { %s584_s20 = scalar_select %p19_p0, %s527_s15, %s21_s19  }
   0x9   : > { %p30_p3 = por %p29_p2, %p28_p1  ;;  %128 = sbr.rel (%p441_p4) target bundleno = 29 (0x1d), region = 24 }
  0x10   : > { %131 = sbr.rel (!%p30_p3) target bundleno = 29 (0x1d), region = 28  ;;  %s133_s21 = sand.u32 (%p30_p3), 1, %s527_s15  }
  0x11   : > { %s442_s22 = sshll.u32 (%p30_p3), %s531_s16, 3  ;;  %s477_s23 = smul.u32 (%p30_p3), 144, %s133_s21 }
  0x12   : > { %s592_s26 = scalar_lea.vmem (%p30_p3), %s655_s0, %s442_s22 }
  0x13   : > { %v199_v0 = vld [vmem:[%s592_s26] sm:$0xff] (%p30_p3)  ;;  %v201_v1 = vld [vmem:[%s592_s26 + $0x10] sm:$0xff] (%p30_p3)  ;;  %s135_s27 = scalar_lea.vmem (%p30_p3), [#allocation3], %s477_s23 }
  0x14   : > { %v203_v2 = vld [vmem:[%s592_s26 + $0x20] sm:$0xff] (%p30_p3)  ;;  %v205_v3 = vld [vmem:[%s592_s26 + $0x30] sm:$0xff] (%p30_p3)  ;;  %200 = vst [vmem:[%s135_s27] sm:$0xff] (%p30_p3), %v199_v0  ;;  %202 = vst [vmem:[%s135_s27 + $0x8] sm:$0xff] (%p30_p3), %v201_v1 }
  0x15   : > { %v207_v4 = vld [vmem:[%s592_s26 + $0x40] sm:$0xff] (%p30_p3)  ;;  %v209_v5 = vld [vmem:[%s592_s26 + $0x50] sm:$0xff] (%p30_p3)  ;;  %204 = vst [vmem:[%s135_s27 + $0x10] sm:$0xff] (%p30_p3), %v203_v2  ;;  %206 = vst [vmem:[%s135_s27 + $0x18] sm:$0xff] (%p30_p3), %v205_v3 }
  0x16   : > { %208 = vst [vmem:[%s135_s27 + $0x20] sm:$0xff] (%p30_p3), %v207_v4  ;;  %210 = vst [vmem:[%s135_s27 + $0x28] sm:$0xff] (%p30_p3), %v209_v5  ;;  %v211_v6 = vld [vmem:[%s592_s26 + $0x60] sm:$0xff] (%p30_p3)  ;;  %v213_v7 = vld [vmem:[%s592_s26 + $0x70] sm:$0xff] (%p30_p3) }
  0x17   : > { %v215_v8 = vld [vmem:[%s592_s26 + $0x80] sm:$0xff]  ;;  %212 = vst [vmem:[%s135_s27 + $0x30] sm:$0xff] %v211_v6  ;;  %214 = vst [vmem:[%s135_s27 + $0x38] sm:$0xff] %v213_v7  ;;  %v217_v9 = vld [vmem:[%s592_s26 + $0x90] sm:$0xff] }
  0x18   : > { %216 = vst [vmem:[%s135_s27 + $0x40] sm:$0xff] %v215_v8  ;;  %v219_v10 = vld [vmem:[%s592_s26 + $0xa0] sm:$0xff]  ;;  %v221_v11 = vld [vmem:[%s592_s26 + $0xb0] sm:$0xff]  ;;  %218 = vst [vmem:[%s135_s27 + $0x48] sm:$0xff] %v217_v9 }
  0x19   : > { %220 = vst [vmem:[%s135_s27 + $0x50] sm:$0xff] %v219_v10  ;;  %222 = vst [vmem:[%s135_s27 + $0x58] sm:$0xff] %v221_v11  ;;  %v223_v12 = vld [vmem:[%s592_s26 + $0xc0] sm:$0xff]  ;;  %v225_v13 = vld [vmem:[%s592_s26 + $0xd0] sm:$0xff] }
  0x1a   : > { %v227_v14 = vld [vmem:[%s592_s26 + $0xe0] sm:$0xff]  ;;  %224 = vst [vmem:[%s135_s27 + $0x60] sm:$0xff] %v223_v12  ;;  %226 = vst [vmem:[%s135_s27 + $0x68] sm:$0xff] %v225_v13  ;;  %v229_v15 = vld [vmem:[%s592_s26 + $0xf0] sm:$0xff] }
  0x1b   : > { %228 = vst [vmem:[%s135_s27 + $0x70] sm:$0xff] %v227_v14  ;;  %v231_v16 = vld [vmem:[%s592_s26 + $0x100] sm:$0xff]  ;;  %v233_v17 = vld [vmem:[%s592_s26 + $0x110] sm:$0xff]  ;;  %230 = vst [vmem:[%s135_s27 + $0x78] sm:$0xff] %v229_v15 }
  0x1c   : > { %232 = vst [vmem:[%s135_s27 + $0x80] sm:$0xff] %v231_v16  ;;  %234 = vst [vmem:[%s135_s27 + $0x88] sm:$0xff] %v233_v17 }
  0x1d PF: > { %p443_p5 = scmp.ge.s32.totalorder %s531_s16, 1  ;;  %p239_p6 = scmp.lt.s32.totalorder %s531_s16, 3 }
  0x1f   : > { %p240_p7 = pnand %p443_p5, %p239_p6 }
  0x20   : > { %s246_s28 = sand.u32 (!%p240_p7), 1, %s523_s14   ;;  %v292_v18 = vlaneseq (!%p240_p7)  ;;  %v533_v19 = vmov (!%p240_p7), 0.0|0.0   ;;  %v270_v21 = vld [vmem:[%s656_s1] sm:$0x3] (!%p240_p7)  ;;  %vm301_vm0 = vcmask (!%p240_p7), 113664   ;;  %vm304_vm1 = vcmask (!%p240_p7), 1045504  }
  0x21   : > { %243 = sbr.rel (%p240_p7) target bundleno = 316 (0x13c), region = 66  ;;  %449 = vmatprep.subr.bf16.mxu0 (!%p240_p7), %v533_v19  ;;  %vm534_vm2 = vmmov (!%p240_p7), 1   ;;  %s289_s6 = sld [smem:[#allocation2]] (!%p240_p7) }
  0x22   : > { %s478_s29 = smul.u32 (!%p240_p7), 144, %s246_s28  ;;  %v293_v20 = vshrl.u32 (!%p240_p7), %v292_v18, 7  ;;  %vm475_vm3 = vmpackc.low (!%p240_p7), %vm304_vm1, %vm534_vm2  ;;  %p267_p8 = scmp.lt.s32.totalorder (!%p240_p7), %s438_s2, 1 }
  0x24   : > { %s618_s5 = scalar_lea.vmem (!%p240_p7), [#allocation3], %s478_s29  ;;  %v298_v25 = vsub.s32 (!%p240_p7), 1, %v293_v20  ;;  %v294_v50 = vsub.s32 (!%p240_p7), 0, %v293_v20 }
  0x25   : > { %v271_v22 = vld [vmem:[%s618_s5] sm:$0xff] (!%p240_p7)  ;;  %v272_v23 = vld [vmem:[%s618_s5 + $0x8] sm:$0xff] (!%p240_p7)  ;;  %v273_v24 = vld [vmem:[%s618_s5 + $0x10] sm:$0xff] (!%p240_p7) }
  0x26   : > { %v450_v26 = vpack.c.bf16 (!%p240_p7), %v272_v23, %v271_v22  ;;  %v274_v27 = vld [vmem:[%s618_s5 + $0x18] sm:$0xff] (!%p240_p7)  ;;  %v299_v28 = vrot.slane (!%p240_p7), %v270_v21, %v298_v25  ;;  %v275_v30 = vld [vmem:[%s618_s5 + $0x20] sm:$0xff] (!%p240_p7)  ;;  %v276_v31 = vld [vmem:[%s618_s5 + $0x28] sm:$0xff] (!%p240_p7)  ;;  %v295_v52 = vrot.slane (!%p240_p7), %v270_v21, %v294_v50 }
  0x27   : > { %v453_v29 = vpack.c.bf16 (!%p240_p7), %v274_v27, %v273_v24  ;;  %v456_v32 = vpack.c.bf16 (!%p240_p7), %v276_v31, %v275_v30  ;;  %v277_v33 = vld [vmem:[%s618_s5 + $0x30] sm:$0xff] (!%p240_p7)  ;;  %v278_v34 = vld [vmem:[%s618_s5 + $0x38] sm:$0xff] (!%p240_p7)  ;;  %v279_v36 = vld [vmem:[%s618_s5 + $0x40] sm:$0xff] (!%p240_p7)  ;;  %v290_v53 = vstv (!%p240_p7), %s289_s6 }
  0x28   : > { %451 = vmatpush1.bf16.msra.mxu0 %v450_v26  ;;  %445 = vmatprep.mubr.msk.f32.mxu0 %vm301_vm0, %v299_v28  ;;  %v459_v35 = vpack.c.bf16 %v278_v34, %v277_v33  ;;  %v280_v37 = vld [vmem:[%s618_s5 + $0x48] sm:$0xff]  ;;  %v281_v39 = vld [vmem:[%s618_s5 + $0x50] sm:$0xff]  ;;  %v282_v40 = vld [vmem:[%s618_s5 + $0x58] sm:$0xff]  ;;  %s663_s2 = smov (!%p267_p8, %s438_s2), 1 }
  0x29   : > { %452 = vmatprep.subr.bf16.mxu0 %v533_v19  ;;  %v462_v38 = vpack.c.bf16 %v280_v37, %v279_v36  ;;  %v465_v41 = vpack.c.bf16 %v282_v40, %v281_v39  ;;  %v283_v42 = vld [vmem:[%s618_s5 + $0x60] sm:$0xff]  ;;  %v284_v43 = vld [vmem:[%s618_s5 + $0x68] sm:$0xff]  ;;  %v285_v45 = vld [vmem:[%s618_s5 + $0x70] sm:$0xff]  ;;  %s269_s9 = scalar_lea.vmem %s658_s3, %s663_s2 }
  0x2a   : > { %v468_v44 = vpack.c.bf16 %v284_v43, %v283_v42  ;;  %v286_v46 = vld [vmem:[%s618_s5 + $0x78] sm:$0xff]  ;;  %v287_v48 = vld [vmem:[%s618_s5 + $0x80] sm:$0xff]  ;;  %v288_v49 = vld [vmem:[%s618_s5 + $0x88] sm:$0x3f] }
  0x2b   : > { %v471_v47 = vpack.c.bf16 %v286_v46, %v285_v45  ;;  %v474_v51 = vpack.c.bf16 %v288_v49, %v287_v48 }
  0x2c   : > { %454 = vmatpush1.bf16.msra.mxu0 %v453_v29 }
  0x2d   : > { %455 = vmatprep.subr.bf16.mxu0 %v533_v19 }
  0x30   : > { %457 = vmatpush1.bf16.msra.mxu0 %v456_v32 }
  0x31   : > { %458 = vmatprep.subr.bf16.mxu0 %v533_v19 }
  0x34   : > { %460 = vmatpush1.bf16.msra.mxu0 %v459_v35 }
  0x35   : > { %461 = vmatprep.subr.bf16.mxu0 %v533_v19 }
  0x38   : > { %463 = vmatpush1.bf16.msra.mxu0 %v462_v38 }
  0x39   : > { %464 = vmatprep.subr.bf16.mxu0 %v533_v19 }
  0x3c   : > { %466 = vmatpush1.bf16.msra.mxu0 %v465_v41 }
  0x3d   : > { %467 = vmatprep.subr.bf16.mxu0 %v533_v19 }
  0x40   : > { %469 = vmatpush1.bf16.msra.mxu0 %v468_v44 }
  0x41   : > { %470 = vmatprep.subr.bf16.mxu0 %v533_v19 }
  0x44   : > { %472 = vmatpush1.bf16.msra.mxu0 %v471_v47 }
  0x45   : > { %473 = vmatprep.subr.bf16.mxu0 %v533_v19 }
  0x48   : > { %476 = vmatpush1.bf16.msk.msra.mxu0 %vm475_vm3, %v474_v51 }
  0x4b   : > { %373 = vmatmul.mubr.f32.vlgmr.msra.gmra.mrb[0].mxu0 %v295_v52 }
 0x11e   : > { %v374_v54 = vpop.f32.mrb[0].mxu0 }
 0x11f   : > { %v375_v55 = vadd.f32 %v374_v54, %v290_v53  ;;  %v376_v56 = vpop.f32.mrb[1].mxu0 }
 0x121   : > { %v446_v57 = vmul.f32 -1.442695, %v375_v55 }
 0x123   : > { %505 = vpow2.f32 %v446_v57 }
 0x12d   : > { %v506_v58 = vpop.eup %505 }
 0x12e   : > { %v381_v59 = vadd.f32 1.0, %v506_v58 }
 0x130   : > { %507 = vrcp.f32 %v381_v59 }
 0x13a   : > { %v508_v60 = vpop.eup %507 }
 0x13b   : > { %384 = vst [vmem:[%s269_s9] sm:$0x1] %v508_v60 }
 0x13c PF: > { %p11_p9 = scmp.ge.s32.totalorder %s575_s17, 4   ;;  %s659_s14 = smov %s527_s15 }
 0x13d   : > { %s660_s15 = smov %s584_s20  ;;  %s661_s16 = smov %s575_s17 }
 0x13e   :  { %13 = sbr.rel (!%p11_p9) target bundleno = 4 (0x4), region = 105 }

</bundles_post_ra>
